<compile_context>
chip_gen: v5e
topology: v5e:2x2
jax: 0.10.0
libtpu: 0.0.40
codegen_flags: <defaults>
</compile_context>

<pallas_src>
import math

import jax
import jax.numpy as jnp
from jax.experimental import pallas as pl
from jax.experimental.pallas import tpu as pltpu


def _round_up(x, m):
    return (x + m - 1) // m * m


# ----------------------------------------------------------------------------
# Kernel: out = onehot(t) @ act_table @ W2 + b2
# ----------------------------------------------------------------------------
def step_embedding_kernel(t_ref, act_ref, w2_ref, b2_ref, o_ref):
    # t_ref:   (Bp, 1)        int32   clamped timesteps
    # act_ref: (Tp, dim_p)    bf16    = swish(sin_table @ W1 + b1), zero-padded
    # w2_ref:  (dim_p, dim_p) bf16    zero-padded
    # b2_ref:  (1, dim_p)     f32     zero-padded
    # o_ref:   (Bp, dim_p)    f32
    Bp = t_ref.shape[0]
    Tp = act_ref.shape[0]

    # Embedding lookup as a one-hot matmul on the MXU (no cross-sublane gather).
    row_ids = jax.lax.broadcasted_iota(jnp.int32, (Bp, Tp), dimension=1)
    onehot = (row_ids == t_ref[...]).astype(jnp.bfloat16)               # (Bp, Tp)
    h = jnp.dot(onehot, act_ref[...],
                preferred_element_type=jnp.float32)                     # (Bp, dim_p)

    # Second Linear(dim, dim).  h holds exactly bf16-representable values
    # (selected rows of a bf16 table), so the cast below is lossless.
    out = jnp.dot(h.astype(jnp.bfloat16), w2_ref[...],
                  preferred_element_type=jnp.float32) + b2_ref[...]
    o_ref[...] = out.astype(o_ref.dtype)


# ----------------------------------------------------------------------------
# Parameter construction (matches the torch module)
# ----------------------------------------------------------------------------
def make_sinusoidal_table(T, d_model):
    assert d_model % 2 == 0
    freqs = jnp.arange(0, d_model, 2, dtype=jnp.float32) / d_model * math.log(10000.0)
    freqs = jnp.exp(-freqs)                                    # (d_model//2,)
    pos = jnp.arange(T, dtype=jnp.float32)                     # (T,)
    ang = pos[:, None] * freqs[None, :]                        # (T, d_model//2)
    emb = jnp.stack([jnp.sin(ang), jnp.cos(ang)], axis=-1)     # (T, d_model//2, 2)
    return emb.reshape(T, d_model)                             # interleaved sin/cos


def init_params(key, T, d_model, dim):
    k1, k2 = jax.random.split(key)
    # torch xavier_uniform_ on Linear(in, out): bound = sqrt(6/(in+out))
    b1 = math.sqrt(6.0 / (d_model + dim))
    w1 = jax.random.uniform(k1, (d_model, dim), jnp.float32, -b1, b1)
    b2 = math.sqrt(6.0 / (dim + dim))
    w2 = jax.random.uniform(k2, (dim, dim), jnp.float32, -b2, b2)
    bias1 = jnp.zeros((1, dim), jnp.float32)
    bias2 = jnp.zeros((1, dim), jnp.float32)
    table = make_sinusoidal_table(T, d_model)
    return table, w1, bias1, w2, bias2


def prepare_params(table, w1, b1, w2, b2):
    """One-time (per weight update) precompute:
    fold Embedding -> Linear -> Swish into a bf16 lookup table; pad the
    second Linear to lane width (multiple of 128) and T to a multiple of 8."""
    T = table.shape[0]
    dim = w1.shape[1]
    dim_p = _round_up(dim, 128)
    T_p = _round_up(T, 8)
    h = table @ w1 + b1                      # (T, dim) f32
    h = h * jax.nn.sigmoid(h)                # Swish
    act_table = jnp.pad(h, ((0, T_p - T), (0, dim_p - dim))).astype(jnp.bfloat16)
    w2_p = jnp.pad(w2, ((0, dim_p - dim), (0, dim_p - dim))).astype(jnp.bfloat16)
    b2_p = jnp.pad(b2, ((0, 0), (0, dim_p - dim))).astype(jnp.float32)
    return act_table, w2_p, b2_p, T, dim


# ----------------------------------------------------------------------------
# Wrapper
# ----------------------------------------------------------------------------
def step_embedding(t, act_table, w2_p, b2_p, T, dim):
    dim_p = act_table.shape[1]
    B = t.shape[0]
    Bp = _round_up(max(B, 8), 8)

    # Clamp out-of-range timesteps (torch's embedding lookup would raise).
    t_i32 = jnp.clip(t.astype(jnp.int32), 0, T - 1)
    t2d = jnp.pad(t_i32, (0, Bp - B)).reshape(Bp, 1)

    vmem = lambda: pl.BlockSpec(memory_space=pltpu.MemorySpace.VMEM)
    out = pl.pallas_call(
        step_embedding_kernel,
        out_shape=jax.ShapeDtypeStruct((Bp, dim_p), jnp.float32),
        in_specs=[vmem(), vmem(), vmem(), vmem()],
        out_specs=vmem(),
    )(t2d, act_table, w2_p, b2_p)
    return out[:B, :dim]


def step_embedding_ref(t, table, w1, b1, w2, b2):
    idx = jnp.clip(t.astype(jnp.int32), 0, table.shape[0] - 1)
    x = jnp.take(table, idx, axis=0)
    h = x @ w1 + b1
    h = h * jax.nn.sigmoid(h)
    return h @ w2 + b2


if __name__ == "__main__":
    T, d_model, dim = 64, 32, 64
    B = 8

    key = jax.random.PRNGKey(0)
    k_param, k_t = jax.random.split(key)
    table, w1, b1, w2, b2 = init_params(k_param, T, d_model, dim)
    t = jax.random.randint(k_t, (B,), 0, T, dtype=jnp.int32)

    act_table, w2_p, b2_p, T_real, dim = prepare_params(table, w1, b1, w2, b2)

    out = step_embedding(t, act_table, w2_p, b2_p, T_real, dim)
    out = jax.block_until_ready(out)

    ref = step_embedding_ref(t, table, w1, b1, w2, b2)
    assert out.shape == (B, dim)
    # bf16 MXU operands -> relaxed tolerance vs the f32 reference
    assert jnp.allclose(out, ref, atol=2e-2, rtol=2e-2), "mismatch vs reference"

    print("KERNEL_OK")
</pallas_src>

<mosaic_0001>
module attributes {stable_mosaic.version = 11 : i64} {
  func.func @step_embedding_kernel(%arg0: memref<8x1xi32, #tpu.memory_space<vmem>>, %arg1: memref<64x128xbf16, #tpu.memory_space<vmem>>, %arg2: memref<128x128xbf16, #tpu.memory_space<vmem>>, %arg3: memref<1x128xf32, #tpu.memory_space<vmem>>, %arg4: memref<8x128xf32, #tpu.memory_space<vmem>>) attributes {dimension_semantics = [], scalar_prefetch = 0 : i64, scratch_operands = 0 : i64, tpu.core_type = #tpu.core_type<tc>} {
    %0 = tpu.iota {dimensions = array<i32: 1>} : vector<8x64xi32>
    %c0 = arith.constant 0 : index
    %c0_0 = arith.constant 0 : index
    %1 = vector.load %arg0[%c0, %c0_0] : memref<8x1xi32, #tpu.memory_space<vmem>>, vector<8x1xi32>
    %2 = vector.broadcast %1 : vector<8x1xi32> to vector<8x64xi32>
    %3 = arith.cmpi eq, %0, %2 : vector<8x64xi32>
    %4 = arith.extui %3 : vector<8x64xi1> to vector<8x64xi32>
    %5 = arith.sitofp %4 : vector<8x64xi32> to vector<8x64xf32>
    %6 = arith.truncf %5 : vector<8x64xf32> to vector<8x64xbf16>
    %c0_1 = arith.constant 0 : index
    %c0_2 = arith.constant 0 : index
    %7 = vector.load %arg1[%c0_1, %c0_2] : memref<64x128xbf16, #tpu.memory_space<vmem>>, vector<64x128xbf16>
    %cst = arith.constant dense<0.000000e+00> : vector<8x128xf32>
    %8 = tpu.matmul %6, %7, %cst {dimension_numbers = #tpu.dot_dimension_numbers<[1], [0], [0], [1], [0, 0, 1, 1], [], []>} : vector<8x64xbf16>, vector<64x128xbf16>, vector<8x128xf32> -> vector<8x128xf32>
    %9 = arith.truncf %8 : vector<8x128xf32> to vector<8x128xbf16>
    %c0_3 = arith.constant 0 : index
    %c0_4 = arith.constant 0 : index
    %10 = vector.load %arg2[%c0_3, %c0_4] : memref<128x128xbf16, #tpu.memory_space<vmem>>, vector<128x128xbf16>
    %cst_5 = arith.constant dense<0.000000e+00> : vector<8x128xf32>
    %11 = tpu.matmul %9, %10, %cst_5 {dimension_numbers = #tpu.dot_dimension_numbers<[1], [0], [0], [1], [0, 0, 1, 1], [], []>} : vector<8x128xbf16>, vector<128x128xbf16>, vector<8x128xf32> -> vector<8x128xf32>
    %c0_6 = arith.constant 0 : index
    %c0_7 = arith.constant 0 : index
    %12 = vector.load %arg3[%c0_6, %c0_7] : memref<1x128xf32, #tpu.memory_space<vmem>>, vector<1x128xf32>
    %13 = vector.broadcast %12 : vector<1x128xf32> to vector<8x128xf32>
    %14 = arith.addf %11, %13 : vector<8x128xf32>
    %c0_8 = arith.constant 0 : index
    %c0_9 = arith.constant 0 : index
    %15 = vector.load %arg4[%c0_8, %c0_9] : memref<8x128xf32, #tpu.memory_space<vmem>>, vector<8x128xf32>
    tpu.vector_store %arg4[%c0_8, %c0_9], %14 {strides = array<i32>} : memref<8x128xf32, #tpu.memory_space<vmem>>, vector<8x128xf32>,
    return
  }
}

</mosaic_0001>

<bundles_post_ra>
// kernel: tpu_custom_call.1
= control target key start
LH: loop header
LB: loop body
LE: loop exit
PB: predicated region body
PF: predicated region fallthrough
CT: control target
= control target key end

     0   :  { %9 = vsyncpa [#allocation3], 0  ;;  %s407_s0 = inlined_call_operand.vmem [shape: s32[8,1], index: 0, kind: input, shape index: {}]   ;;  %s408_s1 = inlined_call_operand.hbm [shape: bf16[64,128], index: 1, kind: input, shape index: {}]   ;;  %s409_s2 = inlined_call_operand.hbm [shape: bf16[128,128], index: 2, kind: input, shape index: {}]   ;;  %s410_s3 = inlined_call_operand.vmem [shape: f32[1,128], index: 3, kind: input, shape index: {}]   ;;  %s411_s4 = inlined_call_operand.hbm [shape: f32[8,128], index: 4, kind: output, shape index: {}]  }
   0x1   :  { %10 = vsyncpa [#allocation6], 0 }
   0x2   :  { %11 = vsyncpa [#allocation4], 0  ;;  %s18_s17 = sshll.u32 %s408_s1, 4  ;;  %s360_s18 = smov [#allocation2]   ;;  %s19_s17 = int_to_ptr.hbm [resolvable:$true] %s18_s17 }
   0x3   :  { %s20_s19 = sshll.u32 %s360_s18, 4  ;;  %s31_s22 = sshll.u32 %s409_s2, 4  ;;  %s21_s19 = int_to_ptr.vmem [resolvable:$true] %s20_s19  ;;  %s32_s22 = int_to_ptr.hbm [resolvable:$true] %s31_s22 }
   0x4   :  { %s361_s23 = smov 64   ;;  %s362_s24 = smov 4  }
   0x5   :  { %26 = dma.hbm_to_vmem [thread:$0]  %s19_s17, 512, %s21_s19, [#allocation3], %s361_s23, %s361_s23, %s362_s24  }
   0x6   :  { %s363_s25 = smov [#allocation5]  }
   0x7   :  { %s33_s26 = sshll.u32 %s363_s25, 4  ;;  %s34_s26 = int_to_ptr.vmem [resolvable:$true] %s33_s26 }
   0x8   :  { %39 = dma.hbm_to_vmem [thread:$0]  %s32_s22, 1024, %s34_s26, [#allocation6], %s361_s23, %s361_s23, %s362_s24  }
   0x9   :  { %354 = dma.done.wait [#allocation3], 512  }
   0xa   :  { %355 = vsyncadd [#allocation3], 4294966784 }
   0xb   :  { %356 = dma.done.wait [#allocation6], 1024  }
   0xc   :  { %357 = vsyncadd [#allocation6], 4294966272  ;;  %v364_v0 = vmov 0   ;;  %v53_v1 = vld [vmem:[%s407_s0] sm:$0xff]  ;;  %v264_v2 = vld [vmem:[#allocation2 + $0x18] sm:$0xff]  ;;  %v51_v12 = vlaneseq  ;;  %v365_v16 = vmov 0.0  }
   0xd   :  { %280 = vset.pattern.permute.xlu0 %v364_v0  ;;  %101 = vmatpush.bf16.msra.mxu0 %v264_v2  ;;  %v263_v3 = vld [vmem:[#allocation2 + $0x10] sm:$0xff]  ;;  %v262_v4 = vld [vmem:[#allocation2 + $0x8] sm:$0xff]  ;;  %v261_v5 = vld [vmem:[#allocation2] sm:$0xff]  ;;  %vm93_vm1 = vcmask 523264   ;;  %s366_s28 = smov [#allocation7]   ;;  %s200_s6 = sshll.u32 %s411_s4, 4  ;;  %s201_s6 = int_to_ptr.hbm [resolvable:$true] %s200_s6 }
   0xe   :  { %55 = vperm.xlu0 %280, %v53_v1   ;;  %v272_v6 = vld [vmem:[#allocation5 + $0x38] sm:$0xff]  ;;  %v271_v7 = vld [vmem:[#allocation5 + $0x30] sm:$0xff]  ;;  %v270_v8 = vld [vmem:[#allocation5 + $0x28] sm:$0xff]  ;;  %v52_v14 = vand.u32 127, %v51_v12  ;;  %s198_s29 = sshll.u32 %s366_s28, 4  ;;  %s199_s29 = int_to_ptr.vmem [resolvable:$true] %s198_s29 }
   0xf   :  { %179 = vmatpush.bf16.msra.mxu1 %v272_v6  ;;  %v269_v9 = vld [vmem:[#allocation5 + $0x20] sm:$0xff]  ;;  %v268_v10 = vld [vmem:[#allocation5 + $0x18] sm:$0xff]  ;;  %v267_v11 = vld [vmem:[#allocation5 + $0x10] sm:$0xff] }
  0x10   :  { %v266_v13 = vld [vmem:[#allocation5 + $0x8] sm:$0xff]  ;;  %v265_v19 = vld [vmem:[#allocation5] sm:$0xff] }
  0x11   :  { %102 = vmatpush.bf16.msra.mxu0 %v263_v3  ;;  %v281_v23 = vld [vmem:[%s410_s3] ss:$0 sm:$0xff] }
  0x13   :  { %180 = vmatpush.bf16.msra.mxu1 %v271_v7 }
  0x15   :  { %103 = vmatpush.bf16.msra.mxu0 %v262_v4 }
  0x17   :  { %181 = vmatpush.bf16.msra.mxu1 %v270_v8 }
  0x19   :  { %104 = vmatpush.bf16.msra.mxu0 %v261_v5 }
  0x1b   :  { %182 = vmatpush.bf16.msra.mxu1 %v269_v9 }
  0x1f   :  { %183 = vmatpush.bf16.msra.mxu1 %v268_v10 }
  0x23   :  { %184 = vmatpush.bf16.msra.mxu1 %v267_v11 }
  0x27   :  { %185 = vmatpush.bf16.msra.mxu1 %v266_v13 }
  0x2b   :  { %186 = vmatpush.bf16.msra.mxu1 %v265_v19 }
  0x80   :  { %v56_v15 = vpop.permute.xlu0 %55 }
  0x81   :  { %vm57_vm0 = vcmp.eq.s32.totalorder %v52_v14, %v56_v15 }
  0x82   :  { %v211_v17 = vsel %vm57_vm0, 1.0, %v365_v16 }
  0x83   :  { %v60_v18 = vpack.c.bf16 %v211_v17, %v211_v17 }
  0x85   :  { %228 = vmatmul.msk.bf16.vlgmr.msra.gmra.mxu0 %vm93_vm1, %v60_v18 }
 0x102   :  { %v106_v20 = vpop.f32.mrf.mxu0 }
 0x103   :  { %v110_v21 = vpack.c.bf16 %v106_v20, %v106_v20 }
 0x105   :  { %187 = vmatmul.bf16.vlgmr.msra.gmra.mxu1 %v110_v21 }
 0x10a   :  { %v108_v22 = vpop.f32.mrf.mxu0 }
 0x182   :  { %v188_v24 = vpop.f32.mrf.mxu1 }
 0x183   :  { %v189_v25 = vadd.f32 %v281_v23, %v188_v24 }
 0x185   :  { %192 = vst [vmem:[#allocation7] sm:$0xff] %v189_v25 }
 0x186   :  { %203 = dma.vmem_to_hbm [thread:$0]  %s199_s29, 128, %s201_s6, [#allocation4]  }
 0x18a   :  { %v190_v26 = vpop.f32.mrf.mxu1 }
 0x18b   :  { %358 = dma.done.wait [#allocation4], 128  }
 0x18c   :  { %359 = vsyncadd [#allocation4], 4294967168 }
 0x18d   :  { %208 = vsyncpa [#allocation3], 1 }
 0x18e   :  { %209 = vsyncpa [#allocation6], 1 }
 0x18f   :  { %210 = vsyncpa [#allocation4], 1 }

</bundles_post_ra>
